<compile_context>
chip_gen: v7x
topology: tpu7x:2x2x1
jax: 0.10.0
libtpu: 0.0.40
codegen_flags: <defaults>
</compile_context>

<pallas_src>
import functools

import jax
import jax.numpy as jnp
from jax.experimental import pallas as pl
from jax.experimental.pallas import tpu as pltpu


def _default_activation_dtype():
    """bf16 tanh on v6e/v7x (bf16-capable EUP/VPU); f32 elsewhere (v5e-safe)."""
    try:
        kind = jax.devices()[0].device_kind.lower()
    except Exception:
        return jnp.float32
    if any(tag in kind for tag in ("v6", "v7", "trillium")):
        return jnp.bfloat16
    return jnp.float32


def _choose_tile(B, tile_b):
    """Large tiles amortize ~0.35us/step overhead; keep >=2 steps for megacore."""
    if B >= 2 * tile_b:
        return tile_b
    half = -(-B // 2)                   # ceil(B / 2) -> two grid steps when possible
    return max(8, -(-half // 8) * 8)    # round up to sublane multiple


def _joint_encoder_kernel(x_ref, yd_ref,
                          w0x_ref, w0yd_ref, b0_ref,
                          w1_ref, b1_ref,
                          wm_ref, bm_ref, wv_ref, bv_ref,
                          mean_ref, logvar_ref, *, act_dtype):
    """One grid step: a (tile_b, .) batch slab -> (tile_b, latent) mean & log_var."""
    # ---- Layer 0: tanh(x @ W0x + [y, delta] @ W0yd + b0) -------------------
    h = jnp.dot(x_ref[...].astype(jnp.bfloat16), w0x_ref[...],
                preferred_element_type=jnp.float32)
    # [y, delta] contribution: the contracting dim is tiny (2), so exact f32
    # outer products on the VPU are used instead of a degenerate MXU pass.
    yd = yd_ref[...].astype(jnp.float32)                # (tb, dy+dd)
    w0yd = w0yd_ref[...]                                # (dy+dd, h0) f32
    for c in range(w0yd.shape[0]):                      # unrolled (2 iters)
        h = h + yd[:, c:c + 1] * w0yd[c:c + 1, :]
    h = jnp.tanh((h + b0_ref[...]).astype(act_dtype)).astype(jnp.bfloat16)

    # ---- Layer 1: tanh(h @ W1 + b1) ----------------------------------------
    h = jnp.dot(h, w1_ref[...], preferred_element_type=jnp.float32) + b1_ref[...]
    h = jnp.tanh(h.astype(act_dtype)).astype(jnp.bfloat16)

    # ---- Heads: narrow lane outputs written directly (no padded slab) ------
    mean_ref[...] = (jnp.dot(h, wm_ref[...], preferred_element_type=jnp.float32)
                     + bm_ref[...])
    logvar_ref[...] = (jnp.dot(h, wv_ref[...], preferred_element_type=jnp.float32)
                       + bv_ref[...])


def pack_joint_encoder_params(params, dx, dy=1, dd=1):
    """One-time packing: split W0 by input source; bf16 for the big matrices."""
    w0 = params["w0"]
    return {
        "w0x": w0[:dx].astype(jnp.bfloat16),
        "w0yd": w0[dx:dx + dy + dd].astype(jnp.float32),   # tiny; exact f32 path
        "b0": params["b0"].astype(jnp.float32),
        "w1": params["w1"].astype(jnp.bfloat16),
        "b1": params["b1"].astype(jnp.float32),
        "wm": params["wm"].astype(jnp.bfloat16),
        "bm": params["bm"].astype(jnp.float32),
        "wv": params["wv"].astype(jnp.bfloat16),
        "bv": params["bv"].astype(jnp.float32),
    }


@functools.partial(jax.jit, static_argnames=("latent_dim", "tile_b", "act_dtype"))
def joint_encoder_forward(x, y, delta, packed, latent_dim, tile_b=512, act_dtype=None):
    """Runs Joint_encoder.forward(x, y, delta) -> (mean, log_var)."""
    if act_dtype is None:
        act_dtype = _default_activation_dtype()

    # torch semantics: unsqueeze 1-D y / delta to (B, 1); merge into one stream.
    if y.ndim == 1:
        y = y[:, None]
    if delta.ndim == 1:
        delta = delta[:, None]
    yd = jnp.concatenate([y, delta], axis=-1)            # (B, dy+dd), tiny

    B, dx = x.shape
    dyd = yd.shape[1]
    h0 = packed["w0x"].shape[1]
    h1 = packed["w1"].shape[1]

    tb = _choose_tile(B, tile_b)
    grid = (pl.cdiv(B, tb),)                             # partial last tile is masked

    row = lambda d: pl.BlockSpec((tb, d), lambda i: (i, 0))    # walks the batch axis
    full = lambda a: pl.BlockSpec(a.shape, lambda i: (0, 0))   # resident whole array

    flops = 2 * B * (dx * h0 + dyd * h0 + h0 * h1 + 2 * h1 * latent_dim)
    transcendentals = B * (h0 + h1)
    bytes_accessed = (4 * B * (dx + dyd) + 8 * B * latent_dim
                      + 2 * (dx * h0 + h0 * h1 + 2 * h1 * latent_dim)
                      + 4 * (dyd * h0 + h0 + h1 + 2 * latent_dim))

    mean, log_var = pl.pallas_call(
        functools.partial(_joint_encoder_kernel, act_dtype=act_dtype),
        out_shape=(jax.ShapeDtypeStruct((B, latent_dim), jnp.float32),
                   jax.ShapeDtypeStruct((B, latent_dim), jnp.float32)),
        grid_spec=pltpu.PrefetchScalarGridSpec(
            num_scalar_prefetch=0,
            grid=grid,
            in_specs=[
                row(dx), row(dyd),
                full(packed["w0x"]), full(packed["w0yd"]), full(packed["b0"]),
                full(packed["w1"]), full(packed["b1"]),
                full(packed["wm"]), full(packed["bm"]),
                full(packed["wv"]), full(packed["bv"]),
            ],
            out_specs=(pl.BlockSpec((tb, latent_dim), lambda i: (i, 0)),
                       pl.BlockSpec((tb, latent_dim), lambda i: (i, 0))),
        ),
        compiler_params=pltpu.CompilerParams(
            dimension_semantics=("parallel",),
        ),
        cost_estimate=pl.CostEstimate(
            flops=flops,
            transcendentals=transcendentals,
            bytes_accessed=bytes_accessed,
        ),
    )(x, yd,
      packed["w0x"], packed["w0yd"], packed["b0"],
      packed["w1"], packed["b1"],
      packed["wm"], packed["bm"], packed["wv"], packed["bv"])

    return mean, log_var


def init_params(key, layer_sizes, latent_dim):
    """Deterministic parameter init. Weights stored as (in, out)."""
    params = {}
    keys = jax.random.split(key, 2 * (len(layer_sizes) - 1) + 4)
    ki = 0
    for i, (fan_in, fan_out) in enumerate(zip(layer_sizes[:-1], layer_sizes[1:])):
        scale = 1.0 / jnp.sqrt(fan_in)
        params[f"w{i}"] = scale * jax.random.normal(keys[ki], (fan_in, fan_out), jnp.float32); ki += 1
        params[f"b{i}"] = scale * jax.random.normal(keys[ki], (1, fan_out), jnp.float32); ki += 1
    fan_in = layer_sizes[-1]
    scale = 1.0 / jnp.sqrt(fan_in)
    params["wm"] = scale * jax.random.normal(keys[ki], (fan_in, latent_dim), jnp.float32); ki += 1
    params["bm"] = scale * jax.random.normal(keys[ki], (1, latent_dim), jnp.float32); ki += 1
    params["wv"] = scale * jax.random.normal(keys[ki], (fan_in, latent_dim), jnp.float32); ki += 1
    params["bv"] = scale * jax.random.normal(keys[ki], (1, latent_dim), jnp.float32); ki += 1
    return params


def _reference_forward(x, y, delta, params):
    """Pure-JAX f32 reference of the same forward pass."""
    if y.ndim == 1:
        y = y[:, None]
    if delta.ndim == 1:
        delta = delta[:, None]
    h = jnp.concatenate([x, y, delta], axis=-1)
    h = jnp.tanh(h @ params["w0"] + params["b0"])
    h = jnp.tanh(h @ params["w1"] + params["b1"])
    mean = h @ params["wm"] + params["bm"]
    log_var = h @ params["wv"] + params["bv"]
    return mean, log_var


if __name__ == "__main__":
    # Module-consistent shapes: x is (B, 30), y / delta are 1-D per-sample
    # scalars (survival time, censoring indicator) -> concat dim 32.
    DX, DY, DD = 30, 1, 1
    layer_sizes = [DX + DY + DD, 64, 32]
    latent_dim = 16

    key = jax.random.PRNGKey(0)
    kx, ky, kd, kp = jax.random.split(key, 4)
    params = init_params(kp, layer_sizes, latent_dim)
    packed = pack_joint_encoder_params(params, DX, DY, DD)

    # Case 1: batch large enough for a 2-step parallel batch grid.
    B1 = 256
    x1 = jax.random.normal(kx, (B1, DX), jnp.float32)
    y1 = jax.random.normal(ky, (B1,), jnp.float32)                  # 1-D -> unsqueeze
    d1 = (jax.random.uniform(kd, (B1,)) > 0.5).astype(jnp.float32)  # 1-D -> unsqueeze
    m1, lv1 = joint_encoder_forward(x1, y1, d1, packed, latent_dim)
    jax.block_until_ready((m1, lv1))
    m1_ref, lv1_ref = _reference_forward(x1, y1, d1, params)
    assert m1.shape == (B1, latent_dim) and lv1.shape == (B1, latent_dim)
    assert jnp.allclose(m1, m1_ref, atol=5e-2, rtol=5e-2)    # bf16 matmul tolerance
    assert jnp.allclose(lv1, lv1_ref, atol=5e-2, rtol=5e-2)

    # Case 2: tiny ragged batch (exercises the masked partial last tile).
    B2 = 5
    x2, y2, d2 = x1[:B2], y1[:B2], d1[:B2]
    m2, lv2 = joint_encoder_forward(x2, y2, d2, packed, latent_dim)
    jax.block_until_ready((m2, lv2))
    m2_ref, lv2_ref = _reference_forward(x2, y2, d2, params)
    assert m2.shape == (B2, latent_dim) and lv2.shape == (B2, latent_dim)
    assert jnp.allclose(m2, m2_ref, atol=5e-2, rtol=5e-2)
    assert jnp.allclose(lv2, lv2_ref, atol=5e-2, rtol=5e-2)

    print("KERNEL_OK")
</pallas_src>

<mosaic_0001>
module attributes {stable_mosaic.version = 11 : i64} {
  func.func @_joint_encoder_kernel(%arg0: i32, %arg1: memref<128x30xf32, #tpu.memory_space<vmem>>, %arg2: memref<128x2xf32, #tpu.memory_space<vmem>>, %arg3: memref<30x64xbf16, #tpu.memory_space<vmem>>, %arg4: memref<2x64xf32, #tpu.memory_space<vmem>>, %arg5: memref<1x64xf32, #tpu.memory_space<vmem>>, %arg6: memref<64x32xbf16, #tpu.memory_space<vmem>>, %arg7: memref<1x32xf32, #tpu.memory_space<vmem>>, %arg8: memref<32x16xbf16, #tpu.memory_space<vmem>>, %arg9: memref<1x16xf32, #tpu.memory_space<vmem>>, %arg10: memref<32x16xbf16, #tpu.memory_space<vmem>>, %arg11: memref<1x16xf32, #tpu.memory_space<vmem>>, %arg12: memref<128x16xf32, #tpu.memory_space<vmem>>, %arg13: memref<128x16xf32, #tpu.memory_space<vmem>>) attributes {dimension_semantics = [#tpu.dimension_semantics<parallel>], iteration_bounds = array<i64: 2>, scalar_prefetch = 0 : i64, scratch_operands = 0 : i64, tpu.core_type = #tpu.core_type<tc>, window_params = [{transform_indices = @transform_0, window_bounds = array<i64: 128, 30>}, {transform_indices = @transform_1, window_bounds = array<i64: 128, 2>}, {pipeline_mode = #tpu.pipeline_mode<synchronous>, transform_indices = @transform_2, window_bounds = array<i64: 30, 64>}, {pipeline_mode = #tpu.pipeline_mode<synchronous>, transform_indices = @transform_3, window_bounds = array<i64: 2, 64>}, {pipeline_mode = #tpu.pipeline_mode<synchronous>, transform_indices = @transform_4, window_bounds = array<i64: 1, 64>}, {pipeline_mode = #tpu.pipeline_mode<synchronous>, transform_indices = @transform_5, window_bounds = array<i64: 64, 32>}, {pipeline_mode = #tpu.pipeline_mode<synchronous>, transform_indices = @transform_6, window_bounds = array<i64: 1, 32>}, {pipeline_mode = #tpu.pipeline_mode<synchronous>, transform_indices = @transform_7, window_bounds = array<i64: 32, 16>}, {pipeline_mode = #tpu.pipeline_mode<synchronous>, transform_indices = @transform_8, window_bounds = array<i64: 1, 16>}, {pipeline_mode = #tpu.pipeline_mode<synchronous>, transform_indices = @transform_9, window_bounds = array<i64: 32, 16>}, {pipeline_mode = #tpu.pipeline_mode<synchronous>, transform_indices = @transform_10, window_bounds = array<i64: 1, 16>}, {transform_indices = @transform_11, window_bounds = array<i64: 128, 16>}, {transform_indices = @transform_12, window_bounds = array<i64: 128, 16>}]} {
    %c0 = arith.constant 0 : index
    %c0_0 = arith.constant 0 : index
    %0 = vector.load %arg1[%c0, %c0_0] : memref<128x30xf32, #tpu.memory_space<vmem>>, vector<128x30xf32>
    %1 = arith.truncf %0 : vector<128x30xf32> to vector<128x30xbf16>
    %c0_1 = arith.constant 0 : index
    %c0_2 = arith.constant 0 : index
    %2 = vector.load %arg3[%c0_1, %c0_2] : memref<30x64xbf16, #tpu.memory_space<vmem>>, vector<30x64xbf16>
    %cst = arith.constant dense<0.000000e+00> : vector<128x64xf32>
    %3 = tpu.matmul %1, %2, %cst {dimension_numbers = #tpu.dot_dimension_numbers<[1], [0], [0], [1], [0, 0, 1, 1], [], []>} : vector<128x30xbf16>, vector<30x64xbf16>, vector<128x64xf32> -> vector<128x64xf32>
    %c0_3 = arith.constant 0 : index
    %c0_4 = arith.constant 0 : index
    %4 = vector.load %arg2[%c0_3, %c0_4] : memref<128x2xf32, #tpu.memory_space<vmem>>, vector<128x2xf32>
    %c0_5 = arith.constant 0 : index
    %c0_6 = arith.constant 0 : index
    %5 = vector.load %arg4[%c0_5, %c0_6] : memref<2x64xf32, #tpu.memory_space<vmem>>, vector<2x64xf32>
    %6 = vector.extract_strided_slice %4 {offsets = [0, 0], sizes = [128, 1], strides = [1, 1]} : vector<128x2xf32> to vector<128x1xf32>
    %7 = vector.extract_strided_slice %5 {offsets = [0, 0], sizes = [1, 64], strides = [1, 1]} : vector<2x64xf32> to vector<1x64xf32>
    %8 = vector.broadcast %6 : vector<128x1xf32> to vector<128x64xf32>
    %9 = vector.broadcast %7 : vector<1x64xf32> to vector<128x64xf32>
    %10 = arith.mulf %8, %9 : vector<128x64xf32>
    %11 = arith.addf %3, %10 : vector<128x64xf32>
    %12 = vector.extract_strided_slice %4 {offsets = [0, 1], sizes = [128, 1], strides = [1, 1]} : vector<128x2xf32> to vector<128x1xf32>
    %13 = vector.extract_strided_slice %5 {offsets = [1, 0], sizes = [1, 64], strides = [1, 1]} : vector<2x64xf32> to vector<1x64xf32>
    %14 = vector.broadcast %12 : vector<128x1xf32> to vector<128x64xf32>
    %15 = vector.broadcast %13 : vector<1x64xf32> to vector<128x64xf32>
    %16 = arith.mulf %14, %15 : vector<128x64xf32>
    %17 = arith.addf %11, %16 : vector<128x64xf32>
    %c0_7 = arith.constant 0 : index
    %c0_8 = arith.constant 0 : index
    %18 = vector.load %arg5[%c0_7, %c0_8] : memref<1x64xf32, #tpu.memory_space<vmem>>, vector<1x64xf32>
    %19 = vector.broadcast %18 : vector<1x64xf32> to vector<128x64xf32>
    %20 = arith.addf %17, %19 : vector<128x64xf32>
    %21 = math.tanh %20 : vector<128x64xf32>
    %22 = arith.truncf %21 : vector<128x64xf32> to vector<128x64xbf16>
    %c0_9 = arith.constant 0 : index
    %c0_10 = arith.constant 0 : index
    %23 = vector.load %arg6[%c0_9, %c0_10] : memref<64x32xbf16, #tpu.memory_space<vmem>>, vector<64x32xbf16>
    %cst_11 = arith.constant dense<0.000000e+00> : vector<128x32xf32>
    %24 = tpu.matmul %22, %23, %cst_11 {dimension_numbers = #tpu.dot_dimension_numbers<[1], [0], [0], [1], [0, 0, 1, 1], [], []>} : vector<128x64xbf16>, vector<64x32xbf16>, vector<128x32xf32> -> vector<128x32xf32>
    %c0_12 = arith.constant 0 : index
    %c0_13 = arith.constant 0 : index
    %25 = vector.load %arg7[%c0_12, %c0_13] : memref<1x32xf32, #tpu.memory_space<vmem>>, vector<1x32xf32>
    %26 = vector.broadcast %25 : vector<1x32xf32> to vector<128x32xf32>
    %27 = arith.addf %24, %26 : vector<128x32xf32>
    %28 = math.tanh %27 : vector<128x32xf32>
    %29 = arith.truncf %28 : vector<128x32xf32> to vector<128x32xbf16>
    %c0_14 = arith.constant 0 : index
    %c0_15 = arith.constant 0 : index
    %30 = vector.load %arg8[%c0_14, %c0_15] : memref<32x16xbf16, #tpu.memory_space<vmem>>, vector<32x16xbf16>
    %cst_16 = arith.constant dense<0.000000e+00> : vector<128x16xf32>
    %31 = tpu.matmul %29, %30, %cst_16 {dimension_numbers = #tpu.dot_dimension_numbers<[1], [0], [0], [1], [0, 0, 1, 1], [], []>} : vector<128x32xbf16>, vector<32x16xbf16>, vector<128x16xf32> -> vector<128x16xf32>
    %c0_17 = arith.constant 0 : index
    %c0_18 = arith.constant 0 : index
    %32 = vector.load %arg9[%c0_17, %c0_18] : memref<1x16xf32, #tpu.memory_space<vmem>>, vector<1x16xf32>
    %33 = vector.broadcast %32 : vector<1x16xf32> to vector<128x16xf32>
    %34 = arith.addf %31, %33 : vector<128x16xf32>
    %c0_19 = arith.constant 0 : index
    %c0_20 = arith.constant 0 : index
    %35 = vector.load %arg12[%c0_19, %c0_20] : memref<128x16xf32, #tpu.memory_space<vmem>>, vector<128x16xf32>
    tpu.vector_store %arg12[%c0_19, %c0_20], %34 {strides = array<i32>} : memref<128x16xf32, #tpu.memory_space<vmem>>, vector<128x16xf32>,
    %c0_21 = arith.constant 0 : index
    %c0_22 = arith.constant 0 : index
    %36 = vector.load %arg10[%c0_21, %c0_22] : memref<32x16xbf16, #tpu.memory_space<vmem>>, vector<32x16xbf16>
    %cst_23 = arith.constant dense<0.000000e+00> : vector<128x16xf32>
    %37 = tpu.matmul %29, %36, %cst_23 {dimension_numbers = #tpu.dot_dimension_numbers<[1], [0], [0], [1], [0, 0, 1, 1], [], []>} : vector<128x32xbf16>, vector<32x16xbf16>, vector<128x16xf32> -> vector<128x16xf32>
    %c0_24 = arith.constant 0 : index
    %c0_25 = arith.constant 0 : index
    %38 = vector.load %arg11[%c0_24, %c0_25] : memref<1x16xf32, #tpu.memory_space<vmem>>, vector<1x16xf32>
    %39 = vector.broadcast %38 : vector<1x16xf32> to vector<128x16xf32>
    %40 = arith.addf %37, %39 : vector<128x16xf32>
    %c0_26 = arith.constant 0 : index
    %c0_27 = arith.constant 0 : index
    %41 = vector.load %arg13[%c0_26, %c0_27] : memref<128x16xf32, #tpu.memory_space<vmem>>, vector<128x16xf32>
    tpu.vector_store %arg13[%c0_26, %c0_27], %40 {strides = array<i32>} : memref<128x16xf32, #tpu.memory_space<vmem>>, vector<128x16xf32>,
    return
  }
  func.func @transform_0(%arg0: i32) -> (i32, i32) {
    %c0_i32 = arith.constant 0 : i32
    %c0_i32_0 = arith.constant 0 : i32
    return %arg0, %c0_i32 : i32, i32
  }
  func.func @transform_1(%arg0: i32) -> (i32, i32) {
    %c0_i32 = arith.constant 0 : i32
    %c0_i32_0 = arith.constant 0 : i32
    return %arg0, %c0_i32 : i32, i32
  }
  func.func @transform_2(%arg0: i32) -> (i32, i32) {
    %c0_i32 = arith.constant 0 : i32
    %c0_i32_0 = arith.constant 0 : i32
    %c0_i32_1 = arith.constant 0 : i32
    return %c0_i32, %c0_i32_0 : i32, i32
  }
  func.func @transform_3(%arg0: i32) -> (i32, i32) {
    %c0_i32 = arith.constant 0 : i32
    %c0_i32_0 = arith.constant 0 : i32
    %c0_i32_1 = arith.constant 0 : i32
    return %c0_i32, %c0_i32_0 : i32, i32
  }
  func.func @transform_4(%arg0: i32) -> (i32, i32) {
    %c0_i32 = arith.constant 0 : i32
    %c0_i32_0 = arith.constant 0 : i32
    %c0_i32_1 = arith.constant 0 : i32
    return %c0_i32, %c0_i32_0 : i32, i32
  }
  func.func @transform_5(%arg0: i32) -> (i32, i32) {
    %c0_i32 = arith.constant 0 : i32
    %c0_i32_0 = arith.constant 0 : i32
    %c0_i32_1 = arith.constant 0 : i32
    return %c0_i32, %c0_i32_0 : i32, i32
  }
  func.func @transform_6(%arg0: i32) -> (i32, i32) {
    %c0_i32 = arith.constant 0 : i32
    %c0_i32_0 = arith.constant 0 : i32
    %c0_i32_1 = arith.constant 0 : i32
    return %c0_i32, %c0_i32_0 : i32, i32
  }
  func.func @transform_7(%arg0: i32) -> (i32, i32) {
    %c0_i32 = arith.constant 0 : i32
    %c0_i32_0 = arith.constant 0 : i32
    %c0_i32_1 = arith.constant 0 : i32
    return %c0_i32, %c0_i32_0 : i32, i32
  }
  func.func @transform_8(%arg0: i32) -> (i32, i32) {
    %c0_i32 = arith.constant 0 : i32
    %c0_i32_0 = arith.constant 0 : i32
    %c0_i32_1 = arith.constant 0 : i32
    return %c0_i32, %c0_i32_0 : i32, i32
  }
  func.func @transform_9(%arg0: i32) -> (i32, i32) {
    %c0_i32 = arith.constant 0 : i32
    %c0_i32_0 = arith.constant 0 : i32
    %c0_i32_1 = arith.constant 0 : i32
    return %c0_i32, %c0_i32_0 : i32, i32
  }
  func.func @transform_10(%arg0: i32) -> (i32, i32) {
    %c0_i32 = arith.constant 0 : i32
    %c0_i32_0 = arith.constant 0 : i32
    %c0_i32_1 = arith.constant 0 : i32
    return %c0_i32, %c0_i32_0 : i32, i32
  }
  func.func @transform_11(%arg0: i32) -> (i32, i32) {
    %c0_i32 = arith.constant 0 : i32
    %c0_i32_0 = arith.constant 0 : i32
    return %arg0, %c0_i32 : i32, i32
  }
  func.func @transform_12(%arg0: i32) -> (i32, i32) {
    %c0_i32 = arith.constant 0 : i32
    %c0_i32_0 = arith.constant 0 : i32
    return %arg0, %c0_i32 : i32, i32
  }
}

</mosaic_0001>

<bundles_post_ra>
// kernel: joint_encoder_forward.1
= control target key start
LH: loop header
LB: loop body
LE: loop exit
PB: predicated region body
PF: predicated region fallthrough
CT: control target
= control target key end

     0   :  { %s1825_s21 = smov 0   ;;  %s2188_s0 = inlined_call_operand.vmem [shape: f32[256,30], index: 0, kind: input, shape index: {}]   ;;  %s2189_s1 = inlined_call_operand.vmem [shape: f32[256,2], index: 1, kind: input, shape index: {}]   ;;  %s2190_s2 = inlined_call_operand.vmem [shape: bf16[30,64], index: 2, kind: input, shape index: {}]   ;;  %s2191_s3 = inlined_call_operand.vmem [shape: f32[2,64], index: 3, kind: input, shape index: {}]   ;;  %s2192_s4 = inlined_call_operand.vmem [shape: f32[1,64], index: 4, kind: input, shape index: {}]   ;;  %s2193_s5 = inlined_call_operand.vmem [shape: bf16[64,32], index: 5, kind: input, shape index: {}]   ;;  %s2194_s6 = inlined_call_operand.vmem [shape: f32[1,32], index: 6, kind: input, shape index: {}]   ;;  %s2195_s7 = inlined_call_operand.vmem [shape: bf16[32,16], index: 7, kind: input, shape index: {}]   ;;  %s2196_s8 = inlined_call_operand.vmem [shape: f32[1,16], index: 8, kind: input, shape index: {}]   ;;  %s2197_s9 = inlined_call_operand.vmem [shape: bf16[32,16], index: 9, kind: input, shape index: {}]   ;;  %s2198_s10 = inlined_call_operand.vmem [shape: f32[1,16], index: 10, kind: input, shape index: {}]   ;;  %s2199_s11 = inlined_call_operand.vmem [shape: f32[256,16], index: 11, kind: output, shape index: {0}]   ;;  %s2200_s12 = inlined_call_operand.vmem [shape: f32[256,16], index: 12, kind: output, shape index: {1}]  }
   0x1 LB: > { %s1468_s22 = sadd.s32 4294967295, %s1756_s21   ;;  %p1472_p0 = scmp.ge.s32.totalorder %s1756_s21, 1  ;;  %s1756_s21 = sphi %s1825_s21, %s23_s21  }
   0x2   : > { %p377_p1 = scmp.lt.s32.totalorder %s1756_s21, 3 }
   0x4   : > { %p378_p2 = pnand %p1472_p0, %p377_p1 }
   0x5   : > { %v1676_v0 = vld [vmem:[%s2190_s2] sm:$0xff] (!%p378_p2)   ;;  %vm635_vm0 = vcmask (!%p378_p2), 1046528   ;;  %v1677_v1 = vld [vmem:[%s2190_s2 + $0x8] sm:$0x7f] (!%p378_p2)   ;;  %s1473_s27 = sshll.u32 (!%p378_p2), %s1468_s22, 4  ;;  %v1758_v3 = vmov (!%p378_p2), 0  }
   0x6   : > { %381 = sbr.rel (%p378_p2) target bundleno = 728 (0x2d8), region = 64  ;;  %1571 = vmatprep.subr.bf16.mxu0 (!%p378_p2), %v1676_v0  ;;  %v637_v2 = vsel (!%p378_p2), %vm635_vm0, %v1677_v1, 0  ;;  %p430_p3 = scmp.lt.s32.totalorder (!%p378_p2), %s1473_s27, 31  ;;  %1667 = vset.pattern.permute.xlu1 (!%p378_p2), %v1758_v3  ;;  %vm610_vm1 = vcmask (!%p378_p2), 244736   ;;  %v1759_v28 = vmov (!%p378_p2), 1   ;;  %v1678_v45 = vld [vmem:[%s2193_s5] sm:$0xff] (!%p378_p2)  }
   0x7   : > { %1572 = vmatpush3.bf16.msra.mxu0 (!%p378_p2), %v1676_v0  ;;  %1666 = vset.pattern.permute.xlu0 (!%p378_p2), %v1758_v3  ;;  %v1679_v46 = vld [vmem:[%s2193_s5 + $0x8] sm:$0xff] (!%p378_p2)   ;;  %v1680_v47 = vld [vmem:[%s2193_s5 + $0x10] sm:$0xff] (!%p378_p2)   ;;  %v1681_v48 = vld [vmem:[%s2193_s5 + $0x18] sm:$0xff] (!%p378_p2)   ;;  %vm922_vm2 = vcmask (!%p378_p2), 523264   ;;  %vm1091_vm3 = vcmask (!%p378_p2), 261120   ;;  %vm1213_vm4 = vcmask (!%p378_p2), 130048  }
   0x8   : > { %1655 = vmatprep.subr.msk.bf16.mxu0 (!%p378_p2), %vm635_vm0, %v1677_v1  ;;  %1591 = vmatprep.subr.bf16.mxu1 (!%p378_p2), %v1678_v45  ;;  %v1682_v50 = vld [vmem:[%s2195_s7] sm:$0xff] (!%p378_p2)  }
   0x9   : > { %1592 = vmatpush3.bf16.msra.mxu1 (!%p378_p2), %v1678_v45  ;;  %v1916_v51 = vld [vmem:[%s2197_s9] sm:$0xff] (!%p378_p2)  }
   0xa   : > { %1593 = vmatprep.subr.bf16.mxu1 (!%p378_p2), %v1679_v46 }
   0xb   : > { %1574 = vmatpush3.bf16.msra.mxu0 (!%p378_p2), %v637_v2 }
   0xc   : > { %1615 = vmatprep.subr.bf16.mxu0 (!%p378_p2), %v1682_v50 }
   0xd   : > { %s2202_s27 = smov (!%p430_p3, %s1473_s27), 31  ;;  %1594 = vmatpush3.bf16.msra.mxu1 %v1679_v46 }
   0xe   : > { %s1841_s28 = sshll.u32 %s2202_s27, 3  ;;  %1595 = vmatprep.subr.bf16.mxu1 %v1680_v47 }
   0xf   : > { %s1847_s13 = scalar_lea.vmem %s2188_s0, %s1841_s28  ;;  %s1859_s16 = scalar_lea.vmem %s2189_s1, %s1841_s28 }
  0x10   : > { %v454_v4 = vld [vmem:[%s1847_s13] sm:$0xff]  ;;  %v455_v5 = vld [vmem:[%s1847_s13 + $0x8] sm:$0xff]  ;;  %v456_v6 = vld [vmem:[%s1847_s13 + $0x10] sm:$0xff] }
  0x11   : > { %v470_v7 = vpack.c.bf16 %v455_v5, %v454_v4  ;;  %v457_v8 = vld [vmem:[%s1847_s13 + $0x18] sm:$0xff]  ;;  %v458_v9 = vld [vmem:[%s1847_s13 + $0x20] sm:$0xff]  ;;  %v459_v10 = vld [vmem:[%s1847_s13 + $0x28] sm:$0xff]  ;;  %1596 = vmatpush3.bf16.msra.mxu1 %v1680_v47  ;;  %v579_v5 = vlaneseq }
  0x12   : > { %v471_v11 = vpack.c.bf16 %v457_v8, %v456_v6  ;;  %v472_v12 = vpack.c.bf16 %v459_v10, %v458_v9  ;;  %v460_v13 = vld [vmem:[%s1847_s13 + $0x30] sm:$0xff]  ;;  %v461_v14 = vld [vmem:[%s1847_s13 + $0x38] sm:$0xff]  ;;  %v462_v16 = vld [vmem:[%s1847_s13 + $0x40] sm:$0xff]  ;;  %1597 = vmatprep.subr.bf16.mxu1 %v1681_v48 }
  0x13   : > { %1575 = vmatprep.mubr.msk.bf16.mxu0 %vm610_vm1, %v470_v7  ;;  %v484_v15 = vld [vmem:[%s1859_s16 + $0x10] sm:$0xff]  ;;  %v463_v17 = vld [vmem:[%s1847_s13 + $0x48] sm:$0xff]  ;;  %v482_v18 = vld [vmem:[%s1859_s16] sm:$0xff]  ;;  %v473_v20 = vpack.c.bf16 %v461_v14, %v460_v13  ;;  %v580_v7 = vshrl.u32 %v579_v5, 7 }
  0x14   : > { %1576 = vmatmul.mubr.msk.bf16.vlgmr.msra.gmra.mrb[0].mxu0 %vm610_vm1, %v471_v11  ;;  %511 = vperm.xlu1 %1667, %v484_v15   ;;  %v485_v19 = vld [vmem:[%s1859_s16 + $0x18] sm:$0xff]  ;;  %v474_v21 = vpack.c.bf16 %v463_v17, %v462_v16  ;;  %v483_v22 = vld [vmem:[%s1859_s16 + $0x8] sm:$0xff]  ;;  %v464_v24 = vld [vmem:[%s1847_s13 + $0x50] sm:$0xff] }
  0x15   : > { %1579 = vmatprep.mubr.msk.bf16.mxu0 %vm610_vm1, %v472_v12  ;;  %501 = vperm.xlu0 %1666, %v482_v18   ;;  %v487_v23 = vld [vmem:[%s1859_s16 + $0x28] sm:$0xff]  ;;  %v465_v25 = vld [vmem:[%s1847_s13 + $0x58] sm:$0xff]  ;;  %v466_v26 = vld [vmem:[%s1847_s13 + $0x60] sm:$0xff]  ;;  %v581_v9 = vsub.s32 0, %v580_v7  ;;  %v802_v12 = vsub.s32 1, %v580_v7 }
  0x16   : > { %v467_v27 = vld [vmem:[%s1847_s13 + $0x68] sm:$0xff]  ;;  %v475_v29 = vpack.c.bf16 %v465_v25, %v464_v24  ;;  %v468_v33 = vld [vmem:[%s1847_s13 + $0x70] sm:$0xff]  ;;  %v469_v34 = vld [vmem:[%s1847_s13 + $0x78] sm:$0xff]  ;;  %1598 = vmatpush3.bf16.msra.mxu1 %v1681_v48  ;;  %1616 = vmatpush3.bf16.msra.mxu0 %v1682_v50  ;;  %s2081_s13 = scalar_lea.vmem %s2199_s11, %s1841_s28 }
  0x17   : > { %v491_v30 = vld [vmem:[%s1859_s16 + $0x48] sm:$0xff]  ;;  %v476_v31 = vpack.c.bf16 %v467_v27, %v466_v26  ;;  %v486_v35 = vld [vmem:[%s1859_s16 + $0x20] sm:$0xff]  ;;  %v477_v36 = vpack.c.bf16 %v469_v34, %v468_v33  ;;  %v488_v37 = vld [vmem:[%s1859_s16 + $0x30] sm:$0xff]  ;;  %1635 = vmatprep.subr.bf16.mxu1 %v1916_v51 }
  0x18   : > { %516 = vperm.xlu1 %1667, %v485_v19   ;;  %v495_v32 = vld [vmem:[%s1859_s16 + $0x68] sm:$0xff]  ;;  %v489_v38 = vld [vmem:[%s1859_s16 + $0x38] sm:$0xff]  ;;  %v490_v39 = vld [vmem:[%s1859_s16 + $0x40] sm:$0xff] }
  0x19   : > { %506 = vperm.xlu0 %1666, %v483_v22   ;;  %v492_v40 = vld [vmem:[%s1859_s16 + $0x50] sm:$0xff]  ;;  %v493_v41 = vld [vmem:[%s1859_s16 + $0x58] sm:$0xff]  ;;  %v494_v42 = vld [vmem:[%s1859_s16 + $0x60] sm:$0xff] }
  0x1a   : > { %v497_v43 = vld [vmem:[%s1859_s16 + $0x78] sm:$0xff]  ;;  %v496_v44 = vld [vmem:[%s1859_s16 + $0x70] sm:$0xff]  ;;  %v498_v10 = vld [vmem:[%s2191_s3] sm:$0x3]  ;;  %s2087_s16 = scalar_lea.vmem %s2200_s12, %s1841_s28 }
  0x1b   : > { %v1938_v14 = vrot.slane %v498_v10, %v581_v9  ;;  %v1953_v27 = vld [vmem:[%s2192_s4] ss:$0 sm:$0xff] }
  0x1c   : > { %1580 = vmatmul.mubr.msk.bf16.gmra.mrb[4].mxu0 %vm610_vm1, %v473_v20  ;;  %1668 = vset.pattern.permute.xlu1 %v1759_v28 }
  0x1d   : > { %1583 = vmatprep.mubr.msk.bf16.mxu0 %vm610_vm1, %v474_v21  ;;  %741 = vperm.xlu1 %1668, %v483_v22  }
  0x1e   : > { %526 = vperm.xlu0 %1666, %v487_v23  }
  0x21   : > { %745 = vperm.xlu1 %1668, %v484_v15   ;;  %v1940_v15 = vrot.slane %v498_v10, %v802_v12 }
  0x22   : > { %546 = vperm.xlu0 %1666, %v491_v30  }
  0x24   : > { %1584 = vmatmul.mubr.msk.bf16.gmra.mrb[8].mxu0 %vm610_vm1, %v475_v29 }
  0x25   : > { %1587 = vmatprep.mubr.msk.bf16.mxu0 %vm610_vm1, %v476_v31  ;;  %1669 = vset.pattern.permute.xlu1 %v1758_v3 }
  0x26   : > { %566 = vperm.xlu0 %1666, %v495_v32   ;;  %521 = vperm.xlu1 %1669, %v486_v35  }
  0x2a   : > { %1674 = vset.pattern.permute.xlu0 %v1759_v28  ;;  %531 = vperm.xlu1 %1669, %v488_v37  }
  0x2b   : > { %737 = vperm.xlu0 %1674, %v482_v18  }
  0x2c   : > { %1588 = vmatmul.mubr.msk.bf16.gmra.mrb[12].mxu0 %vm610_vm1, %v477_v36 }
  0x2e   : > { %536 = vperm.xlu1 %1669, %v489_v38  }
  0x2f   : > { %749 = vperm.xlu0 %1674, %v485_v19  }
  0x32   : > { %1670 = vset.pattern.permute.xlu1 %v1759_v28 }
  0x33   : > { %757 = vperm.xlu1 %1670, %v487_v23   ;;  %753 = vperm.xlu0 %1674, %v486_v35  }
  0x37   : > { %761 = vperm.xlu1 %1670, %v488_v37   ;;  %765 = vperm.xlu0 %1674, %v489_v38  }
  0x3b   : > { %1671 = vset.pattern.permute.xlu1 %v1758_v3  ;;  %769 = vperm.xlu0 %1674, %v490_v39  }
  0x3c   : > { %541 = vperm.xlu1 %1671, %v490_v39  }
  0x3f   : > { %781 = vperm.xlu0 %1674, %v493_v41  }
  0x40   : > { %551 = vperm.xlu1 %1671, %v492_v40  }
  0x43   : > { %785 = vperm.xlu0 %1674, %v494_v42  }
  0x44   : > { %556 = vperm.xlu1 %1671, %v493_v41  }
  0x47   : > { %797 = vperm.xlu0 %1674, %v497_v43  }
  0x48   : > { %1672 = vset.pattern.permute.xlu1 %v1759_v28 }
  0x49   : > { %773 = vperm.xlu1 %1672, %v491_v30  }
  0x4d   : > { %777 = vperm.xlu1 %1672, %v492_v40  }
  0x51   : > { %1673 = vset.pattern.permute.xlu1 %v1758_v3 }
  0x52   : > { %561 = vperm.xlu1 %1673, %v494_v42  }
  0x56   : > { %571 = vperm.xlu1 %1673, %v496_v44  }
  0x5a   : > { %576 = vperm.xlu1 %1673, %v497_v43  }
  0x5e   : > { %1675 = vset.pattern.permute.xlu1 %v1759_v28 }
  0x5f   : > { %789 = vperm.xlu1 %1675, %v495_v32  }
  0x63   : > { %793 = vperm.xlu1 %1675, %v496_v44  }
  0x93   : > { %v512_v49 = vpop.permute.xlu1 %511 }
  0x94   : > { %v502_v57 = vpop.permute.xlu0 %501  ;;  %v585_v17 = vmul.f32 %v1938_v14, %v512_v49 }
  0x95   : > { %v583_v18 = vmul.f32 %v1938_v14, %v502_v57 }
  0x97   : > { %v517_v52 = vpop.permute.xlu1 %516 }
  0x98   : > { %v507_v59 = vpop.permute.xlu0 %506  ;;  %v586_v22 = vmul.f32 %v1938_v14, %v517_v52 }
  0x99   : > { %v584_v26 = vmul.f32 %v1938_v14, %v507_v59 }
  0x9c   : > { %v742_v53 = vpop.permute.xlu1 %741 }
  0x9d   : > { %v527_v61 = vpop.permute.xlu0 %526  ;;  %v805_v34 = vmul.f32 %v1940_v15, %v742_v53 }
  0x9e   : > { %v588_v53 = vmul.f32 %v1938_v14, %v527_v61 }
  0xa0   : > { %v746_v54 = vpop.permute.xlu1 %745 }
  0xa1   : > { %v1921_v63 = vpop.permute.xlu0 %546  ;;  %v806_v23 = vmul.f32 %v1940_v15, %v746_v54 }
  0xa5   : > { %v522_v55 = vpop.permute.xlu1 %521  ;;  %v1925_v1 = vpop.permute.xlu0 %566 }
  0xa6   : > { %v587_v45 = vmul.f32 %v1938_v14, %v522_v55 }
  0xa9   : > { %v532_v56 = vpop.permute.xlu1 %531 }
  0xaa   : > { %v738_v3 = vpop.permute.xlu0 %737  ;;  %v589_v43 = vmul.f32 %v1938_v14, %v532_v56 }
  0xab   : > { %v804_v19 = vmul.f32 %v1940_v15, %v738_v3 }
  0xad   : > { %v537_v58 = vpop.permute.xlu1 %536 }
  0xae   : > { %v750_v8 = vpop.permute.xlu0 %749  ;;  %v590_v48 = vmul.f32 %v1938_v14, %v537_v58 }
  0xaf   : > { %v807_v30 = vmul.f32 %v1940_v15, %v750_v8 }
  0xb2   : > { %v1919_v60 = vpop.permute.xlu1 %757  ;;  %v754_v13 = vpop.permute.xlu0 %753 }
  0xb3   : > { %v808_v54 = vmul.f32 %v1940_v15, %v754_v13  ;;  %v809_v58 = vmul.f32 %v1940_v15, %v1919_v60 }
  0xb6   : > { %v762_v62 = vpop.permute.xlu1 %761  ;;  %v766_v20 = vpop.permute.xlu0 %765 }
  0xb7   : > { %v810_v49 = vmul.f32 %v1940_v15, %v762_v62  ;;  %v811_v55 = vmul.f32 %v1940_v15, %v766_v20 }
  0xba   : > { %v770_v40 = vpop.permute.xlu0 %769 }
  0xbb   : > { %v1923_v0 = vpop.permute.xlu1 %541 }
  0xbc   : > { %v591_v60 = vmul.f32 %v1938_v14, %v1923_v0  ;;  %v812_v0 = vmul.f32 %v1940_v15, %v770_v40 }
  0xbe   : > { %v782_v62 = vpop.permute.xlu0 %781 }
  0xbf   : > { %v1927_v2 = vpop.permute.xlu1 %551 }
  0xc3   : > { %v1929_v4 = vpop.permute.xlu1 %556 }
  0xc8   : > { %v1931_v6 = vpop.permute.xlu1 %773 }
  0xcc   : > { %v1936_v11 = vpop.permute.xlu1 %777 }
  0xd1   : > { %v1942_v16 = vpop.permute.xlu1 %561 }
  0xd5   : > { %v1957_v37 = vpop.permute.xlu1 %571 }
  0xd9   : > { %v1969_v59 = vpop.permute.xlu1 %576 }
  0xe7   : > { %v1577_v21 = vpop.f32.mrb[0].mxu0 }
  0xe8   : > { %v682_v24 = vadd.f32 %v1577_v21, %v585_v17  ;;  %v673_v25 = vpop.f32.mrb[1].mxu0  ;;  %v1976_v17 = vpop.permute.xlu1 %789 }
  0xe9   : > { %v674_v28 = vadd.f32 %v673_v25, %v583_v18  ;;  %v1578_v29 = vpop.f32.mrb[2].mxu0  ;;  %v593_v18 = vmul.f32 %v1938_v14, %v1927_v2 }
  0xea   : > { %v822_v31 = vadd.f32 %v806_v23, %v682_v24  ;;  %v685_v32 = vadd.f32 %v1578_v29, %v586_v22  ;;  %v676_v33 = vpop.f32.mrb[3].mxu0  ;;  %v594_v23 = vmul.f32 %v1938_v14, %v1929_v4  ;;  %v814_v24 = vmul.f32 %v1940_v15, %v1936_v11  ;;  %v786_v29 = vpop.permute.xlu0 %785 }
  0xeb   : > { %v820_v35 = vadd.f32 %v804_v19, %v674_v28  ;;  %v677_v36 = vadd.f32 %v676_v33, %v584_v26  ;;  %v592_v28 = vmul.f32 %v1938_v14, %v1921_v63  ;;  %v815_v33 = vmul.f32 %v1940_v15, %v782_v62 }
  0xec   : > { %v845_v38 = vadd.f32 %v1953_v27, %v822_v31  ;;  %v823_v39 = vadd.f32 %v807_v30, %v685_v32  ;;  %v794_v63 = vpop.permute.xlu1 %793 }
  0xed   : > { %v843_v41 = vadd.f32 %v1953_v27, %v820_v35  ;;  %v821_v42 = vadd.f32 %v805_v34, %v677_v36  ;;  %v813_v36 = vmul.f32 %v1940_v15, %v1931_v6  ;;  %v818_v6 = vmul.f32 %v1940_v15, %v794_v63 }
  0xee   : > { %1686 = vtanh.f32 %v845_v38  ;;  %v846_v44 = vadd.f32 %v1953_v27, %v823_v39 }
  0xef   : > { %1688 = vtanh.f32 %v843_v41  ;;  %v844_v46 = vadd.f32 %v1953_v27, %v821_v42  ;;  %v1581_v47 = vpop.f32.mrb[4].mxu0 }
  0xf0   : > { %1690 = vtanh.f32 %v846_v44  ;;  %v698_v50 = vadd.f32 %v1581_v47, %v589_v43  ;;  %v689_v52 = vpop.f32.mrb[5].mxu0 }
  0xf1   : > { %1692 = vtanh.f32 %v844_v46  ;;  %v690_v56 = vadd.f32 %v689_v52, %v587_v45  ;;  %v1582_v57 = vpop.f32.mrb[6].mxu0  ;;  %v597_v46 = vmul.f32 %v1938_v14, %v1957_v37  ;;  %v598_v37 = vmul.f32 %v1938_v14, %v1969_v59 }
  0xf2   : > { %v826_v3 = vadd.f32 %v810_v49, %v698_v50  ;;  %v701_v5 = vadd.f32 %v1582_v57, %v590_v48  ;;  %v692_v7 = vpop.f32.mrb[7].mxu0  ;;  %v798_v48 = vpop.permute.xlu0 %797  ;;  %v595_v49 = vmul.f32 %v1938_v14, %v1942_v16  ;;  %v816_v16 = vmul.f32 %v1940_v15, %v786_v29  ;;  %v1684_v29 = vld [vmem:[%s2195_s7 + $0x8] sm:$0xff]  }
  0xf3   : > { %v824_v8 = vadd.f32 %v808_v54, %v690_v56  ;;  %v693_v9 = vadd.f32 %v692_v7, %v588_v53  ;;  %1617 = vmatprep.subr.bf16.mxu0 %v1684_v29 }
  0xf4   : > { %v849_v61 = vadd.f32 %v1953_v27, %v826_v3  ;;  %v827_v10 = vadd.f32 %v811_v55, %v701_v5  ;;  %v596_v55 = vmul.f32 %v1938_v14, %v1925_v1  ;;  %1618 = vmatpush3.bf16.msra.mxu0 %v1684_v29 }
  0xf5   : > { %v847_v12 = vadd.f32 %v1953_v27, %v824_v8  ;;  %v825_v13 = vadd.f32 %v809_v58, %v693_v9  ;;  %v819_v58 = vmul.f32 %v1940_v15, %v798_v48 }
  0xf6   : > { %1694 = vtanh.f32 %v849_v61  ;;  %v850_v19 = vadd.f32 %v1953_v27, %v827_v10  ;;  %v817_v61 = vmul.f32 %v1940_v15, %v1976_v17 }
  0xf7   : > { %1696 = vtanh.f32 %v847_v12  ;;  %v848_v20 = vadd.f32 %v1953_v27, %v825_v13  ;;  %v1585_v21 = vpop.f32.mrb[8].mxu0 }
  0xf8   : > { %v1687_v22 = vpop.eup %1686  ;;  %1698 = vtanh.f32 %v850_v19  ;;  %v714_v25 = vadd.f32 %v1585_v21, %v593_v18  ;;  %v705_v2 = vpop.f32.mrb[9].mxu0 }
  0xf9   : > { %v1689_v26 = vpop.eup %1688  ;;  %1700 = vtanh.f32 %v848_v20  ;;  %v706_v30 = vadd.f32 %v705_v2, %v591_v60  ;;  %v1586_v31 = vpop.f32.mrb[10].mxu0 }
  0xfa   : > { %v1691_v32 = vpop.eup %1690  ;;  %v830_v4 = vadd.f32 %v814_v24, %v714_v25  ;;  %v717_v34 = vadd.f32 %v1586_v31, %v594_v23  ;;  %v708_v35 = vpop.f32.mrb[11].mxu0  ;;  %v2033_v31 = vld [vmem:[%s2194_s6] ss:$0 sm:$0xff] }
  0xfb   : > { %v1693_v11 = vpop.eup %1692  ;;  %v828_v38 = vadd.f32 %v812_v0, %v706_v30  ;;  %v709_v39 = vadd.f32 %v708_v35, %v592_v28  ;;  %v876_v41 = vpack.c.bf16 %v1691_v32, %v1687_v22  ;;  %v1685_v30 = vld [vmem:[%s2197_s9 + $0x8] sm:$0xff]  }
  0xfc   : > { %v853_v40 = vadd.f32 %v1953_v27, %v830_v4  ;;  %v831_v42 = vadd.f32 %v815_v33, %v717_v34  ;;  %v875_v43 = vpack.c.bf16 %v1693_v11, %v1689_v26 }
  0xfd   : > { %v851_v44 = vadd.f32 %v1953_v27, %v828_v38  ;;  %v829_v45 = vadd.f32 %v813_v36, %v709_v39 }
  0xfe   : > { %1702 = vtanh.f32 %v853_v40  ;;  %v854_v47 = vadd.f32 %v1953_v27, %v831_v42  ;;  %1599 = vmatprep.mubr.msk.bf16.mxu1 %vm922_vm2, %v875_v43 }
  0xff   : > { %1704 = vtanh.f32 %v851_v44  ;;  %v852_v50 = vadd.f32 %v1953_v27, %v829_v45  ;;  %v1589_v52 = vpop.f32.mrb[12].mxu0  ;;  %1600 = vmatmul.mubr.msk.bf16.vlgmr.msra.gmra.mrb[0].mxu1 %vm922_vm2, %v876_v41 }
 0x100   : > { %v1695_v53 = vpop.eup %1694  ;;  %1706 = vtanh.f32 %v854_v47  ;;  %v730_v54 = vadd.f32 %v1589_v52, %v597_v46  ;;  %v721_v56 = vpop.f32.mrb[13].mxu0  ;;  %1636 = vmatpush3.bf16.msra.mxu1 %v1916_v51 }
 0x101   : > { %v1697_v57 = vpop.eup %1696  ;;  %1708 = vtanh.f32 %v852_v50  ;;  %v722_v3 = vadd.f32 %v721_v56, %v595_v49  ;;  %v1590_v5 = vpop.f32.mrb[14].mxu0  ;;  %1637 = vmatprep.subr.bf16.mxu1 %v1685_v30 }
 0x102   : > { %v1699_v7 = vpop.eup %1698  ;;  %v834_v62 = vadd.f32 %v818_v6, %v730_v54  ;;  %v733_v8 = vadd.f32 %v1590_v5, %v598_v37  ;;  %v724_v59 = vpop.f32.mrb[15].mxu0 }
 0x103   : > { %v1701_v9 = vpop.eup %1700  ;;  %v832_v51 = vadd.f32 %v816_v16, %v722_v3  ;;  %v725_v10 = vadd.f32 %v724_v59, %v596_v55  ;;  %v878_v12 = vpack.c.bf16 %v1699_v7, %v1695_v53 }
 0x104   : > { %v857_v1 = vadd.f32 %v1953_v27, %v834_v62  ;;  %v835_v14 = vadd.f32 %v819_v58, %v733_v8  ;;  %v877_v13 = vpack.c.bf16 %v1701_v9, %v1697_v57  ;;  %1638 = vmatpush3.bf16.msra.mxu1 %v1685_v30 }
 0x105   : > { %v855_v18 = vadd.f32 %v1953_v27, %v832_v51  ;;  %v833_v19 = vadd.f32 %v817_v61, %v725_v10 }
 0x106   : > { %1710 = vtanh.f32 %v857_v1  ;;  %v858_v60 = vadd.f32 %v1953_v27, %v835_v14  ;;  %1603 = vmatprep.mubr.msk.bf16.mxu1 %vm922_vm2, %v877_v13 }
 0x107   : > { %1712 = vtanh.f32 %v855_v18  ;;  %v856_v20 = vadd.f32 %v1953_v27, %v833_v19  ;;  %1604 = vmatmul.mubr.msk.bf16.gmra.mrb[4].mxu1 %vm922_vm2, %v878_v12 }
 0x108   : > { %v1703_v15 = vpop.eup %1702  ;;  %1714 = vtanh.f32 %v858_v60 }
 0x109   : > { %v1705_v17 = vpop.eup %1704  ;;  %1716 = vtanh.f32 %v856_v20 }
 0x10a   : > { %v1707_v21 = vpop.eup %1706 }
 0x10b   : > { %v1709_v22 = vpop.eup %1708  ;;  %v880_v23 = vpack.c.bf16 %v1707_v21, %v1703_v15 }
 0x10c   : > { %v879_v24 = vpack.c.bf16 %v1709_v22, %v1705_v17 }
 0x10e   : > { %1607 = vmatprep.mubr.msk.bf16.mxu1 %vm922_vm2, %v879_v24 }
 0x10f   : > { %1608 = vmatmul.mubr.msk.bf16.gmra.mrb[8].mxu1 %vm922_vm2, %v880_v23 }
 0x110   : > { %v1711_v25 = vpop.eup %1710 }
 0x111   : > { %v1713_v2 = vpop.eup %1712 }
 0x112   : > { %v1715_v26 = vpop.eup %1714 }
 0x113   : > { %v1717_v28 = vpop.eup %1716  ;;  %v882_v0 = vpack.c.bf16 %v1715_v26, %v1711_v25  ;;  %v2075_v26 = vld [vmem:[%s2198_s10] ss:$0 sm:$0xff] }
 0x114   : > { %v881_v27 = vpack.c.bf16 %v1717_v28, %v1713_v2  ;;  %v2070_v2 = vld [vmem:[%s2196_s8] ss:$0 sm:$0xff] }
 0x116   : > { %1611 = vmatprep.mubr.msk.bf16.mxu1 %vm922_vm2, %v881_v27 }
 0x117   : > { %1612 = vmatmul.mubr.msk.bf16.gmra.mrb[12].mxu1 %vm922_vm2, %v882_v0 }
 0x1d2   : > { %v1601_v32 = vpop.f32.mrb[0].mxu1 }
 0x1d3   : > { %v990_v33 = vadd.f32 %v1601_v32, %v2033_v31  ;;  %v981_v4 = vpop.f32.mrb[1].mxu1 }
 0x1d4   : > { %v982_v34 = vadd.f32 %v2033_v31, %v981_v4  ;;  %v1602_v35 = vpop.f32.mrb[2].mxu1 }
 0x1d5   : > { %1718 = vtanh.f32 %v990_v33  ;;  %v993_v11 = vadd.f32 %v1602_v35, %v2033_v31  ;;  %v984_v36 = vpop.f32.mrb[3].mxu1 }
 0x1d6   : > { %1720 = vtanh.f32 %v982_v34  ;;  %v985_v38 = vadd.f32 %v2033_v31, %v984_v36 }
 0x1d7   : > { %1722 = vtanh.f32 %v993_v11 }
 0x1d8   : > { %1724 = vtanh.f32 %v985_v38 }
 0x1da   : > { %v1605_v39 = vpop.f32.mrb[4].mxu1 }
 0x1db   : > { %v1006_v63 = vadd.f32 %v1605_v39, %v2033_v31  ;;  %v997_v41 = vpop.f32.mrb[5].mxu1 }
 0x1dc   : > { %v998_v40 = vadd.f32 %v2033_v31, %v997_v41  ;;  %v1606_v42 = vpop.f32.mrb[6].mxu1 }
 0x1dd   : > { %1726 = vtanh.f32 %v1006_v63  ;;  %v1009_v43 = vadd.f32 %v1606_v42, %v2033_v31  ;;  %v1000_v44 = vpop.f32.mrb[7].mxu1 }
 0x1de   : > { %1728 = vtanh.f32 %v998_v40  ;;  %v1001_v45 = vadd.f32 %v2033_v31, %v1000_v44 }
 0x1df   : > { %v1719_v46 = vpop.eup %1718  ;;  %1730 = vtanh.f32 %v1009_v43 }
 0x1e0   : > { %v1721_v47 = vpop.eup %1720  ;;  %1732 = vtanh.f32 %v1001_v45 }
 0x1e1   : > { %v1723_v6 = vpop.eup %1722 }
 0x1e2   : > { %v1725_v48 = vpop.eup %1724  ;;  %v1061_v49 = vpack.c.bf16 %v1723_v6, %v1719_v46  ;;  %v1609_v50 = vpop.f32.mrb[8].mxu1 }
 0x1e3   : > { %v1022_v52 = vadd.f32 %v1609_v50, %v2033_v31  ;;  %v1013_v53 = vpop.f32.mrb[9].mxu1  ;;  %v1060_v37 = vpack.c.bf16 %v1725_v48, %v1721_v47 }
 0x1e4   : > { %v1014_v54 = vadd.f32 %v2033_v31, %v1013_v53  ;;  %v1610_v56 = vpop.f32.mrb[10].mxu1 }
 0x1e5   : > { %1734 = vtanh.f32 %v1022_v52  ;;  %v1025_v57 = vadd.f32 %v1610_v56, %v2033_v31  ;;  %v1016_v55 = vpop.f32.mrb[11].mxu1  ;;  %1619 = vmatprep.mubr.msk.bf16.mxu0 %vm1091_vm3, %v1060_v37  ;;  %1639 = vmatprep.mubr.msk.bf16.mxu1 %vm1091_vm3, %v1060_v37 }
 0x1e6   : > { %1736 = vtanh.f32 %v1014_v54  ;;  %v1017_v16 = vadd.f32 %v2033_v31, %v1016_v55  ;;  %1620 = vmatmul.mubr.msk.bf16.vlgmr.msra.gmra.mrb[16].mxu0 %vm1091_vm3, %v1061_v49  ;;  %1640 = vmatmul.mubr.msk.bf16.vlgmr.msra.gmra.mrb[16].mxu1 %vm1091_vm3, %v1061_v49 }
 0x1e7   : > { %v1727_v3 = vpop.eup %1726  ;;  %1738 = vtanh.f32 %v1025_v57 }
 0x1e8   : > { %v1729_v5 = vpop.eup %1728  ;;  %1740 = vtanh.f32 %v1017_v16 }
 0x1e9   : > { %v1731_v7 = vpop.eup %1730 }
 0x1ea   : > { %v1733_v58 = vpop.eup %1732  ;;  %v1613_v62 = vpop.f32.mrb[12].mxu1  ;;  %v1063_v8 = vpack.c.bf16 %v1731_v7, %v1727_v3 }
 0x1eb   : > { %v1038_v59 = vadd.f32 %v1613_v62, %v2033_v31  ;;  %v1029_v9 = vpop.f32.mrb[13].mxu1  ;;  %v1062_v61 = vpack.c.bf16 %v1733_v58, %v1729_v5 }
 0x1ec   : > { %v1030_v51 = vadd.f32 %v2033_v31, %v1029_v9  ;;  %v1614_v10 = vpop.f32.mrb[14].mxu1 }
 0x1ed   : > { %1742 = vtanh.f32 %v1038_v59  ;;  %v1041_v12 = vadd.f32 %v1614_v10, %v2033_v31  ;;  %v1032_v1 = vpop.f32.mrb[15].mxu1  ;;  %1623 = vmatprep.mubr.msk.bf16.mxu0 %vm1091_vm3, %v1062_v61  ;;  %1643 = vmatprep.mubr.msk.bf16.mxu1 %vm1091_vm3, %v1062_v61 }
 0x1ee   : > { %1744 = vtanh.f32 %v1030_v51  ;;  %v1033_v14 = vadd.f32 %v2033_v31, %v1032_v1  ;;  %1624 = vmatmul.mubr.msk.bf16.gmra.mrb[20].mxu0 %vm1091_vm3, %v1063_v8  ;;  %1644 = vmatmul.mubr.msk.bf16.gmra.mrb[20].mxu1 %vm1091_vm3, %v1063_v8 }
 0x1ef   : > { %v1735_v13 = vpop.eup %1734  ;;  %1746 = vtanh.f32 %v1041_v12 }
 0x1f0   : > { %v1737_v18 = vpop.eup %1736  ;;  %1748 = vtanh.f32 %v1033_v14 }
 0x1f1   : > { %v1739_v19 = vpop.eup %1738 }
 0x1f2   : > { %v1741_v60 = vpop.eup %1740  ;;  %v1065_v20 = vpack.c.bf16 %v1739_v19, %v1735_v13 }
 0x1f3   : > { %v1064_v15 = vpack.c.bf16 %v1741_v60, %v1737_v18 }
 0x1f5   : > { %1627 = vmatprep.mubr.msk.bf16.mxu0 %vm1091_vm3, %v1064_v15  ;;  %1647 = vmatprep.mubr.msk.bf16.mxu1 %vm1091_vm3, %v1064_v15 }
 0x1f6   : > { %1628 = vmatmul.mubr.msk.bf16.gmra.mrb[24].mxu0 %vm1091_vm3, %v1065_v20  ;;  %1648 = vmatmul.mubr.msk.bf16.gmra.mrb[24].mxu1 %vm1091_vm3, %v1065_v20 }
 0x1f7   : > { %v1743_v17 = vpop.eup %1742 }
 0x1f8   : > { %v1745_v21 = vpop.eup %1744 }
 0x1f9   : > { %v1747_v22 = vpop.eup %1746 }
 0x1fa   : > { %v1749_v23 = vpop.eup %1748  ;;  %v1067_v24 = vpack.c.bf16 %v1747_v22, %v1743_v17 }
 0x1fb   : > { %v1066_v25 = vpack.c.bf16 %v1749_v23, %v1745_v21 }
 0x1fd   : > { %1631 = vmatprep.mubr.msk.bf16.mxu0 %vm1091_vm3, %v1066_v25  ;;  %1651 = vmatprep.mubr.msk.bf16.mxu1 %vm1091_vm3, %v1066_v25 }
 0x1fe   : > { %1632 = vmatmul.mubr.msk.bf16.gmra.mrb[28].mxu0 %vm1091_vm3, %v1067_v24  ;;  %1652 = vmatmul.mubr.msk.bf16.gmra.mrb[28].mxu1 %vm1091_vm3, %v1067_v24 }
 0x2b9   : > { %v1621_v28 = vpop.f32.mrb[16].mxu0  ;;  %v1641_v0 = vpop.f32.mrb[16].mxu1 }
 0x2ba   : > { %v1159_v27 = vadd.f32 %v1621_v28, %v2070_v2  ;;  %v1296_v29 = vadd.f32 %v1641_v0, %v2075_v26  ;;  %v1150_v30 = vpop.f32.mrb[17].mxu0  ;;  %v1287_v31 = vpop.f32.mrb[17].mxu1 }
 0x2bb   : > { %v1151_v32 = vadd.f32 %v2070_v2, %v1150_v30  ;;  %v1288_v33 = vadd.f32 %v2075_v26, %v1287_v31  ;;  %v1622_v4 = vpop.f32.mrb[18].mxu0  ;;  %v1642_v34 = vpop.f32.mrb[18].mxu1 }
 0x2bc   : > { %1216 = vst.msk [vmem:[%s2081_s13 + $0x10] sm:$0xff] %vm1213_vm4, %v1159_v27  ;;  %1352 = vst.msk [vmem:[%s2087_s16 + $0x10] sm:$0xff] %vm1213_vm4, %v1296_v29  ;;  %v1162_v35 = vadd.f32 %v1622_v4, %v2070_v2  ;;  %v1299_v11 = vadd.f32 %v1642_v34, %v2075_v26  ;;  %v1153_v36 = vpop.f32.mrb[19].mxu0  ;;  %v1290_v38 = vpop.f32.mrb[19].mxu1 }
 0x2bd   : > { %1214 = vst.msk [vmem:[%s2081_s13] sm:$0xff] %vm1213_vm4, %v1151_v32  ;;  %1350 = vst.msk [vmem:[%s2087_s16] sm:$0xff] %vm1213_vm4, %v1288_v33  ;;  %v1154_v39 = vadd.f32 %v2070_v2, %v1153_v36  ;;  %v1291_v63 = vadd.f32 %v2075_v26, %v1290_v38 }
 0x2be   : > { %1217 = vst.msk [vmem:[%s2081_s13 + $0x18] sm:$0xff] %vm1213_vm4, %v1162_v35  ;;  %1353 = vst.msk [vmem:[%s2087_s16 + $0x18] sm:$0xff] %vm1213_vm4, %v1299_v11 }
 0x2bf   : > { %1215 = vst.msk [vmem:[%s2081_s13 + $0x8] sm:$0xff] %vm1213_vm4, %v1154_v39  ;;  %1351 = vst.msk [vmem:[%s2087_s16 + $0x8] sm:$0xff] %vm1213_vm4, %v1291_v63 }
 0x2c1   : > { %v1625_v41 = vpop.f32.mrb[20].mxu0  ;;  %v1645_v40 = vpop.f32.mrb[20].mxu1 }
 0x2c2   : > { %v1175_v42 = vadd.f32 %v1625_v41, %v2070_v2  ;;  %v1312_v43 = vadd.f32 %v1645_v40, %v2075_v26  ;;  %v1166_v44 = vpop.f32.mrb[21].mxu0  ;;  %v1303_v45 = vpop.f32.mrb[21].mxu1 }
 0x2c3   : > { %v1167_v46 = vadd.f32 %v2070_v2, %v1166_v44  ;;  %v1304_v47 = vadd.f32 %v2075_v26, %v1303_v45  ;;  %v1626_v6 = vpop.f32.mrb[22].mxu0  ;;  %v1646_v48 = vpop.f32.mrb[22].mxu1 }
 0x2c4   : > { %1220 = vst.msk [vmem:[%s2081_s13 + $0x30] sm:$0xff] %vm1213_vm4, %v1175_v42  ;;  %1356 = vst.msk [vmem:[%s2087_s16 + $0x30] sm:$0xff] %vm1213_vm4, %v1312_v43  ;;  %v1178_v49 = vadd.f32 %v1626_v6, %v2070_v2  ;;  %v1315_v50 = vadd.f32 %v1646_v48, %v2075_v26  ;;  %v1169_v52 = vpop.f32.mrb[23].mxu0  ;;  %v1306_v53 = vpop.f32.mrb[23].mxu1 }
 0x2c5   : > { %1218 = vst.msk [vmem:[%s2081_s13 + $0x20] sm:$0xff] %vm1213_vm4, %v1167_v46  ;;  %1354 = vst.msk [vmem:[%s2087_s16 + $0x20] sm:$0xff] %vm1213_vm4, %v1304_v47  ;;  %v1170_v37 = vadd.f32 %v2070_v2, %v1169_v52  ;;  %v1307_v54 = vadd.f32 %v2075_v26, %v1306_v53 }
 0x2c6   : > { %1221 = vst.msk [vmem:[%s2081_s13 + $0x38] sm:$0xff] %vm1213_vm4, %v1178_v49  ;;  %1357 = vst.msk [vmem:[%s2087_s16 + $0x38] sm:$0xff] %vm1213_vm4, %v1315_v50 }
 0x2c7   : > { %1219 = vst.msk [vmem:[%s2081_s13 + $0x28] sm:$0xff] %vm1213_vm4, %v1170_v37  ;;  %1355 = vst.msk [vmem:[%s2087_s16 + $0x28] sm:$0xff] %vm1213_vm4, %v1307_v54 }
 0x2c9   : > { %v1629_v56 = vpop.f32.mrb[24].mxu0  ;;  %v1649_v57 = vpop.f32.mrb[24].mxu1 }
 0x2ca   : > { %v1191_v55 = vadd.f32 %v1629_v56, %v2070_v2  ;;  %v1328_v16 = vadd.f32 %v1649_v57, %v2075_v26  ;;  %v1182_v3 = vpop.f32.mrb[25].mxu0  ;;  %v1319_v5 = vpop.f32.mrb[25].mxu1 }
 0x2cb   : > { %v1183_v7 = vadd.f32 %v2070_v2, %v1182_v3  ;;  %v1320_v58 = vadd.f32 %v2075_v26, %v1319_v5  ;;  %v1630_v62 = vpop.f32.mrb[26].mxu0  ;;  %v1650_v8 = vpop.f32.mrb[26].mxu1 }
 0x2cc   : > { %1224 = vst.msk [vmem:[%s2081_s13 + $0x50] sm:$0xff] %vm1213_vm4, %v1191_v55  ;;  %1360 = vst.msk [vmem:[%s2087_s16 + $0x50] sm:$0xff] %vm1213_vm4, %v1328_v16  ;;  %v1194_v59 = vadd.f32 %v1630_v62, %v2070_v2  ;;  %v1331_v9 = vadd.f32 %v1650_v8, %v2075_v26  ;;  %v1185_v61 = vpop.f32.mrb[27].mxu0  ;;  %v1322_v51 = vpop.f32.mrb[27].mxu1 }
 0x2cd   : > { %1222 = vst.msk [vmem:[%s2081_s13 + $0x40] sm:$0xff] %vm1213_vm4, %v1183_v7  ;;  %1358 = vst.msk [vmem:[%s2087_s16 + $0x40] sm:$0xff] %vm1213_vm4, %v1320_v58  ;;  %v1186_v10 = vadd.f32 %v2070_v2, %v1185_v61  ;;  %v1323_v12 = vadd.f32 %v2075_v26, %v1322_v51 }
 0x2ce   : > { %1225 = vst.msk [vmem:[%s2081_s13 + $0x58] sm:$0xff] %vm1213_vm4, %v1194_v59  ;;  %1361 = vst.msk [vmem:[%s2087_s16 + $0x58] sm:$0xff] %vm1213_vm4, %v1331_v9 }
 0x2cf   : > { %1223 = vst.msk [vmem:[%s2081_s13 + $0x48] sm:$0xff] %vm1213_vm4, %v1186_v10  ;;  %1359 = vst.msk [vmem:[%s2087_s16 + $0x48] sm:$0xff] %vm1213_vm4, %v1323_v12 }
 0x2d1   : > { %v1633_v1 = vpop.f32.mrb[28].mxu0  ;;  %v1653_v14 = vpop.f32.mrb[28].mxu1 }
 0x2d2   : > { %v1207_v13 = vadd.f32 %v1633_v1, %v2070_v2  ;;  %v1344_v18 = vadd.f32 %v1653_v14, %v2075_v26  ;;  %v1198_v19 = vpop.f32.mrb[29].mxu0  ;;  %v1335_v60 = vpop.f32.mrb[29].mxu1 }
 0x2d3   : > { %v1199_v20 = vadd.f32 %v2070_v2, %v1198_v19  ;;  %v1336_v15 = vadd.f32 %v2075_v26, %v1335_v60  ;;  %v1634_v17 = vpop.f32.mrb[30].mxu0  ;;  %v1654_v21 = vpop.f32.mrb[30].mxu1 }
 0x2d4   : > { %1228 = vst.msk [vmem:[%s2081_s13 + $0x70] sm:$0xff] %vm1213_vm4, %v1207_v13  ;;  %1364 = vst.msk [vmem:[%s2087_s16 + $0x70] sm:$0xff] %vm1213_vm4, %v1344_v18  ;;  %v1210_v22 = vadd.f32 %v1634_v17, %v2070_v2  ;;  %v1347_v23 = vadd.f32 %v1654_v21, %v2075_v26  ;;  %v1201_v24 = vpop.f32.mrb[31].mxu0  ;;  %v1338_v25 = vpop.f32.mrb[31].mxu1 }
 0x2d5   : > { %1226 = vst.msk [vmem:[%s2081_s13 + $0x60] sm:$0xff] %vm1213_vm4, %v1199_v20  ;;  %1362 = vst.msk [vmem:[%s2087_s16 + $0x60] sm:$0xff] %vm1213_vm4, %v1336_v15  ;;  %v1202_v28 = vadd.f32 %v2070_v2, %v1201_v24  ;;  %v1339_v0 = vadd.f32 %v2075_v26, %v1338_v25 }
 0x2d6   : > { %1229 = vst.msk [vmem:[%s2081_s13 + $0x78] sm:$0xff] %vm1213_vm4, %v1210_v22  ;;  %1365 = vst.msk [vmem:[%s2087_s16 + $0x78] sm:$0xff] %vm1213_vm4, %v1347_v23 }
 0x2d7   : > { %1227 = vst.msk [vmem:[%s2081_s13 + $0x68] sm:$0xff] %vm1213_vm4, %v1202_v28  ;;  %1363 = vst.msk [vmem:[%s2087_s16 + $0x68] sm:$0xff] %vm1213_vm4, %v1339_v0 }
 0x2d8 PF: > { %s23_s21 = sadd.s32 1, %s1756_s21  }
 0x2d9   : > { %p20_p4 = scmp.ge.s32.totalorder %s23_s21, 4  }
 0x2db   :  { %22 = sbr.rel (!%p20_p4) target bundleno = 1 (0x1), region = 109 }

</bundles_post_ra>
